<compile_context>
chip_gen: v7x
topology: tpu7x:2x2x1
jax: 0.10.0
libtpu: 0.0.40
codegen_flags: <defaults>
</compile_context>

<pallas_src>
import jax
import jax.numpy as jnp
from jax.experimental import pallas as pl
from jax.experimental.pallas import tpu as pltpu

LANE = 128  # TPU lane width; output is padded to a multiple of this.


def mlp_kernel(x_ref, w_ref, b_ref, o_ref):
    # In-kernel bf16 cast of x (hidden under the MXU dot), f32 accumulation,
    # f32 bias add, lane-dense (128-wide) unmasked store.
    xb = x_ref[...].astype(w_ref.dtype)
    o_ref[...] = (jnp.dot(xb, w_ref[...], preferred_element_type=jnp.float32)
                  + b_ref[...]).astype(o_ref.dtype)


def init_params(key, input_dim, output_dim):
    """Deterministic init mimicking torch.nn.Linear default
    (uniform(-1/sqrt(fan_in), 1/sqrt(fan_in))). Weights stored as [in, out]."""
    dims = [(input_dim, 1024), (1024, 256), (256, output_dim)]
    params = {}
    for idx, (fan_in, fan_out) in enumerate(dims, start=1):
        key, kw, kb = jax.random.split(key, 3)
        bound = 1.0 / jnp.sqrt(jnp.float32(fan_in))
        params[f"w{idx}"] = jax.random.uniform(
            kw, (fan_in, fan_out), jnp.float32, -bound, bound)
        params[f"b{idx}"] = jax.random.uniform(
            kb, (1, fan_out), jnp.float32, -bound, bound)
    return params


def pack_params(params, compute_dtype=jnp.bfloat16):
    """One-time (param-load-time) preprocessing.

    The net is purely affine (no activations), so fold all three layers in f32:
        W123    = W1 @ W2 @ W3
        b_total = b1 @ W2 @ W3 + b2 @ W3 + b3
    then lane-pad the output dim to a multiple of 128 and cast the folded
    weight to the bf16 compute dtype (bias stays f32). Exact algebraically;
    only one bf16 rounding of the folded weight remains.
    """
    w23 = jnp.dot(params["w2"], params["w3"], preferred_element_type=jnp.float32)
    w123 = jnp.dot(params["w1"], w23, preferred_element_type=jnp.float32)
    b_total = (jnp.dot(params["b1"], w23, preferred_element_type=jnp.float32)
               + jnp.dot(params["b2"], params["w3"],
                         preferred_element_type=jnp.float32)
               + params["b3"])
    d_out = w123.shape[1]
    out_pad = max(LANE, ((d_out + LANE - 1) // LANE) * LANE)
    pad = out_pad - d_out
    return {
        "w123": jnp.pad(w123, ((0, 0), (0, pad))).astype(compute_dtype),
        "b_total": jnp.pad(b_total, ((0, 0), (0, pad))).astype(jnp.float32),
        "d_out": d_out,
    }


def _default_tm(batch):
    """Single tile on v5e/v6e (1 TC); split the batch across both TCs on v7x."""
    try:
        kind = jax.devices()[0].device_kind.lower()
    except Exception:
        kind = ""
    if "v7" in kind and batch % 2 == 0 and (batch // 2) % 8 == 0:
        return batch // 2
    return batch


def net_forward(x, packed, *, tm=None):
    """x: [B, input_dim] float32 (cast to bf16 inside the kernel).
    packed: output of pack_params()."""
    B, d_in = x.shape
    out_pad = packed["w123"].shape[1]
    d_out = packed["d_out"]

    if tm is None:
        tm = _default_tm(B)
    assert B % tm == 0, "batch must be divisible by the batch tile"
    assert tm == B or tm % 8 == 0, "batch tile must be a sublane multiple"
    grid = (B // tm,)
    const = lambda i: (0, 0)  # folded weight/bias resident across the batch grid

    flops = 2 * B * d_in * out_pad
    bytes_accessed = (
        x.size * x.dtype.itemsize
        + packed["w123"].size * packed["w123"].dtype.itemsize
        + packed["b_total"].size * packed["b_total"].dtype.itemsize
        + B * out_pad * 4)

    out = pl.pallas_call(
        mlp_kernel,
        out_shape=jax.ShapeDtypeStruct((B, out_pad), jnp.float32),
        grid_spec=pltpu.PrefetchScalarGridSpec(
            num_scalar_prefetch=0,
            grid=grid,
            in_specs=[
                pl.BlockSpec((tm, d_in), lambda i: (i, 0)),   # x tile (f32)
                pl.BlockSpec((d_in, out_pad), const),         # W1@W2@W3 folded, lane-padded (bf16)
                pl.BlockSpec((1, out_pad), const),            # b1@W2@W3 + b2@W3 + b3 (f32)
            ],
            out_specs=pl.BlockSpec((tm, out_pad), lambda i: (i, 0)),
        ),
        compiler_params=pltpu.CompilerParams(
            dimension_semantics=("parallel",),
        ),
        cost_estimate=pl.CostEstimate(
            flops=flops, transcendentals=0, bytes_accessed=bytes_accessed),
    )(x, packed["w123"], packed["b_total"])

    # Drop lane padding outside the kernel (kept so the public shape matches
    # the torch module; see TODO(synk) above for skipping it entirely).
    return out[:, :d_out]


if __name__ == "__main__":
    key = jax.random.PRNGKey(0)

    batch = 128        # batch_generator yields 2*64 = 128 tasks per batch
    input_dim = 32     # embedder.output_dim (synthetic)
    output_dim = 16    # number of primitives (synthetic)

    kx, kp = jax.random.split(key)
    x = jax.random.normal(kx, (batch, input_dim), jnp.float32)
    params = init_params(kp, input_dim, output_dim)
    packed = pack_params(params)

    out = net_forward(x, packed)
    out = jax.block_until_ready(out)
    assert out.shape == (batch, output_dim)

    # Matched reference: same folded bf16 weight / f32 bias, f32 accumulation.
    ref_m = jnp.dot(x.astype(jnp.bfloat16), packed["w123"],
                    preferred_element_type=jnp.float32) + packed["b_total"]
    ref_m = ref_m[:, :output_dim]
    assert jnp.allclose(out, ref_m, atol=2e-3, rtol=2e-2)

    # Original f32 3-layer reference (torch-equivalent semantics). The fold is
    # exact in f32; only the single bf16 rounding of x / W123 remains.
    ref = x @ params["w1"] + params["b1"]
    ref = ref @ params["w2"] + params["b2"]
    ref = ref @ params["w3"] + params["b3"]
    assert jnp.allclose(out, ref, atol=2e-2, rtol=5e-2)

    print("KERNEL_OK")
</pallas_src>

<mosaic_0001>
module attributes {stable_mosaic.version = 11 : i64} {
  func.func @mlp_kernel(%arg0: i32, %arg1: memref<128x32xf32, #tpu.memory_space<vmem>>, %arg2: memref<32x128xbf16, #tpu.memory_space<vmem>>, %arg3: memref<1x128xf32, #tpu.memory_space<vmem>>, %arg4: memref<128x128xf32, #tpu.memory_space<vmem>>) attributes {dimension_semantics = [#tpu.dimension_semantics<parallel>], iteration_bounds = array<i64: 1>, scalar_prefetch = 0 : i64, scratch_operands = 0 : i64, tpu.core_type = #tpu.core_type<tc>, window_params = [{transform_indices = @transform_0, window_bounds = array<i64: 128, 32>}, {pipeline_mode = #tpu.pipeline_mode<synchronous>, transform_indices = @transform_1, window_bounds = array<i64: 32, 128>}, {pipeline_mode = #tpu.pipeline_mode<synchronous>, transform_indices = @transform_2, window_bounds = array<i64: 1, 128>}, {transform_indices = @transform_3, window_bounds = array<i64: 128, 128>}]} {
    %c0 = arith.constant 0 : index
    %c0_0 = arith.constant 0 : index
    %0 = vector.load %arg1[%c0, %c0_0] : memref<128x32xf32, #tpu.memory_space<vmem>>, vector<128x32xf32>
    %1 = arith.truncf %0 : vector<128x32xf32> to vector<128x32xbf16>
    %c0_1 = arith.constant 0 : index
    %c0_2 = arith.constant 0 : index
    %2 = vector.load %arg2[%c0_1, %c0_2] : memref<32x128xbf16, #tpu.memory_space<vmem>>, vector<32x128xbf16>
    %cst = arith.constant dense<0.000000e+00> : vector<128x128xf32>
    %3 = tpu.matmul %1, %2, %cst {dimension_numbers = #tpu.dot_dimension_numbers<[1], [0], [0], [1], [0, 0, 1, 1], [], []>} : vector<128x32xbf16>, vector<32x128xbf16>, vector<128x128xf32> -> vector<128x128xf32>
    %c0_3 = arith.constant 0 : index
    %c0_4 = arith.constant 0 : index
    %4 = vector.load %arg3[%c0_3, %c0_4] : memref<1x128xf32, #tpu.memory_space<vmem>>, vector<1x128xf32>
    %5 = vector.broadcast %4 : vector<1x128xf32> to vector<128x128xf32>
    %6 = arith.addf %3, %5 : vector<128x128xf32>
    %c0_5 = arith.constant 0 : index
    %c0_6 = arith.constant 0 : index
    %7 = vector.load %arg4[%c0_5, %c0_6] : memref<128x128xf32, #tpu.memory_space<vmem>>, vector<128x128xf32>
    tpu.vector_store %arg4[%c0_5, %c0_6], %6 {strides = array<i32>} : memref<128x128xf32, #tpu.memory_space<vmem>>, vector<128x128xf32>,
    return
  }
  func.func @transform_0(%arg0: i32) -> (i32, i32) {
    %c0_i32 = arith.constant 0 : i32
    %c0_i32_0 = arith.constant 0 : i32
    return %arg0, %c0_i32 : i32, i32
  }
  func.func @transform_1(%arg0: i32) -> (i32, i32) {
    %c0_i32 = arith.constant 0 : i32
    %c0_i32_0 = arith.constant 0 : i32
    %c0_i32_1 = arith.constant 0 : i32
    return %c0_i32, %c0_i32_0 : i32, i32
  }
  func.func @transform_2(%arg0: i32) -> (i32, i32) {
    %c0_i32 = arith.constant 0 : i32
    %c0_i32_0 = arith.constant 0 : i32
    %c0_i32_1 = arith.constant 0 : i32
    return %c0_i32, %c0_i32_0 : i32, i32
  }
  func.func @transform_3(%arg0: i32) -> (i32, i32) {
    %c0_i32 = arith.constant 0 : i32
    %c0_i32_0 = arith.constant 0 : i32
    return %arg0, %c0_i32 : i32, i32
  }
}

</mosaic_0001>

<bundles_post_ra>
// kernel: tpu_custom_call.1
= control target key start
LH: loop header
LB: loop body
LE: loop exit
PB: predicated region body
PF: predicated region fallthrough
CT: control target
= control target key end

     0   :  { %vm63_vm0 = vcmask 261120   ;;  %s391_s0 = inlined_call_operand.vmem [shape: f32[128,32], index: 0, kind: input, shape index: {}]   ;;  %s392_s1 = inlined_call_operand.vmem [shape: bf16[32,128], index: 1, kind: input, shape index: {}]   ;;  %s393_s2 = inlined_call_operand.vmem [shape: f32[1,128], index: 2, kind: input, shape index: {}]   ;;  %s394_s3 = inlined_call_operand.hbm [shape: f32[128,128], index: 3, kind: output, shape index: {}]  }
   0x1   :  { %v265_v0 = vld [vmem:[%s392_s1] sm:$0xff]   ;;  %v266_v1 = vld [vmem:[%s392_s1 + $0x8] sm:$0xff]   ;;  %v18_v7 = vld [vmem:[%s391_s0 + $0x10] sm:$0xff] }
   0x2   :  { %238 = vmatprep.subr.bf16.mxu0 %v265_v0  ;;  %258 = vmatprep.subr.bf16.mxu1 %v265_v0  ;;  %v16_v2 = vld [vmem:[%s391_s0] sm:$0xff]  ;;  %v17_v3 = vld [vmem:[%s391_s0 + $0x8] sm:$0xff]  ;;  %v19_v8 = vld [vmem:[%s391_s0 + $0x18] sm:$0xff] }
   0x3   :  { %v24_v4 = vld [vmem:[%s391_s0 + $0x40] sm:$0xff]  ;;  %239 = vmatpush3.bf16.msra.mxu0 %v265_v0  ;;  %260 = vmatpush3.bf16.msra.mxu1 %v265_v0  ;;  %v32_v5 = vpack.c.bf16 %v17_v3, %v16_v2  ;;  %v25_v6 = vld [vmem:[%s391_s0 + $0x48] sm:$0xff]  ;;  %v26_v10 = vld [vmem:[%s391_s0 + $0x50] sm:$0xff]  ;;  %v33_v16 = vpack.c.bf16 %v19_v8, %v18_v7 }
   0x4   :  { %240 = vmatprep.subr.bf16.mxu0 %v266_v1  ;;  %259 = vmatprep.subr.bf16.mxu1 %v266_v1  ;;  %v36_v9 = vpack.c.bf16 %v25_v6, %v24_v4  ;;  %v27_v11 = vld [vmem:[%s391_s0 + $0x58] sm:$0xff]  ;;  %v20_v12 = vld [vmem:[%s391_s0 + $0x20] sm:$0xff]  ;;  %v21_v13 = vld [vmem:[%s391_s0 + $0x28] sm:$0xff] }
   0x5   :  { %242 = vmatprep.mubr.msk.bf16.mxu0 %vm63_vm0, %v32_v5  ;;  %v28_v14 = vld [vmem:[%s391_s0 + $0x60] sm:$0xff]  ;;  %v29_v15 = vld [vmem:[%s391_s0 + $0x68] sm:$0xff]  ;;  %v37_v17 = vpack.c.bf16 %v27_v11, %v26_v10  ;;  %v34_v18 = vpack.c.bf16 %v21_v13, %v20_v12 }
   0x6   :  { %250 = vmatprep.mubr.msk.bf16.mxu1 %vm63_vm0, %v36_v9  ;;  %v38_v19 = vpack.c.bf16 %v29_v15, %v28_v14 }
   0x7   :  { %241 = vmatpush3.bf16.msra.mxu0 %v266_v1  ;;  %261 = vmatpush3.bf16.msra.mxu1 %v266_v1 }
   0x8   :  { %8 = vsyncpa [#allocation3], 0  ;;  %v22_v20 = vld [vmem:[%s391_s0 + $0x30] sm:$0xff]  ;;  %v23_v21 = vld [vmem:[%s391_s0 + $0x38] sm:$0xff] }
   0x9   :  { %v30_v22 = vld [vmem:[%s391_s0 + $0x70] sm:$0xff]  ;;  %v31_v23 = vld [vmem:[%s391_s0 + $0x78] sm:$0xff]  ;;  %v35_v24 = vpack.c.bf16 %v23_v21, %v22_v20  ;;  %v217_v26 = vld [vmem:[%s393_s2] ss:$0 sm:$0xff]  ;;  %s291_s0 = smov [#allocation2]  }
   0xa   :  { %243 = vmatmul.mubr.msk.bf16.vlgmr.msra.gmra.mrb[0].mxu0 %vm63_vm0, %v33_v16  ;;  %251 = vmatmul.mubr.msk.bf16.vlgmr.msra.gmra.mrb[0].mxu1 %vm63_vm0, %v37_v17  ;;  %v39_v25 = vpack.c.bf16 %v31_v23, %v30_v22  ;;  %s206_s2 = sshll.u32 %s291_s0, 4  ;;  %s207_s2 = int_to_ptr.vmem [resolvable:$true] %s206_s2 }
   0xb   :  { %246 = vmatprep.mubr.msk.bf16.mxu0 %vm63_vm0, %v34_v18  ;;  %254 = vmatprep.mubr.msk.bf16.mxu1 %vm63_vm0, %v38_v19  ;;  %s267_s22 = scalar_lea.vmem %s207_s2, 2048  ;;  %p272_p1 = scmp.lt.s32.totalorder %s207_s2, %s207_s2 }
   0xc   :  { %p268_p0 = scmp.ne.s32.totalorder %s207_s2, %s267_s22  ;;  %p273_p2 = scmp.lt.s32.totalorder %s267_s22, %s267_s22 }
   0xe   :  { %p274_p3 = por %p273_p2, %p272_p1 }
  0x10   :  { %p275_p4 = pnand %p274_p3, %p268_p0 }
  0x12   :  { %247 = vmatmul.mubr.msk.bf16.gmra.mrb[4].mxu0 %vm63_vm0, %v35_v24  ;;  %255 = vmatmul.mubr.msk.bf16.gmra.mrb[4].mxu1 %vm63_vm0, %v39_v25 }
  0xdd   :  { %v244_v27 = vpop.f32.mrb[0].mxu0  ;;  %v252_v28 = vpop.f32.mrb[0].mxu1 }
  0xde   :  { %v131_v29 = vadd.f32 %v244_v27, %v217_v26  ;;  %v163_v30 = vadd.f32 %v252_v28, %v217_v26  ;;  %v122_v31 = vpop.f32.mrb[1].mxu0  ;;  %v154_v32 = vpop.f32.mrb[1].mxu1 }
  0xdf   :  { %v123_v33 = vadd.f32 %v217_v26, %v122_v31  ;;  %v155_v34 = vadd.f32 %v217_v26, %v154_v32  ;;  %v245_v35 = vpop.f32.mrb[2].mxu0  ;;  %v253_v36 = vpop.f32.mrb[2].mxu1 }
  0xe0   :  { %187 = vst [vmem:[#allocation2 + $0x10] sm:$0xff] %v131_v29  ;;  %195 = vst [vmem:[#allocation2 + $0x50] sm:$0xff] %v163_v30  ;;  %v134_v37 = vadd.f32 %v245_v35, %v217_v26  ;;  %v166_v38 = vadd.f32 %v253_v36, %v217_v26  ;;  %v125_v39 = vpop.f32.mrb[3].mxu0  ;;  %v157_v40 = vpop.f32.mrb[3].mxu1 }
  0xe1   :  { %185 = vst [vmem:[#allocation2] sm:$0xff] %v123_v33  ;;  %193 = vst [vmem:[#allocation2 + $0x40] sm:$0xff] %v155_v34  ;;  %v126_v41 = vadd.f32 %v217_v26, %v125_v39  ;;  %v158_v42 = vadd.f32 %v217_v26, %v157_v40 }
  0xe2   :  { %188 = vst [vmem:[#allocation2 + $0x18] sm:$0xff] %v134_v37  ;;  %196 = vst [vmem:[#allocation2 + $0x58] sm:$0xff] %v166_v38 }
  0xe3   :  { %186 = vst [vmem:[#allocation2 + $0x8] sm:$0xff] %v126_v41  ;;  %194 = vst [vmem:[#allocation2 + $0x48] sm:$0xff] %v158_v42 }
  0xe5   :  { %v248_v43 = vpop.f32.mrb[4].mxu0  ;;  %v256_v44 = vpop.f32.mrb[4].mxu1 }
  0xe6   :  { %v147_v45 = vadd.f32 %v248_v43, %v217_v26  ;;  %v179_v46 = vadd.f32 %v256_v44, %v217_v26  ;;  %v138_v47 = vpop.f32.mrb[5].mxu0  ;;  %v170_v48 = vpop.f32.mrb[5].mxu1 }
  0xe7   :  { %v139_v49 = vadd.f32 %v217_v26, %v138_v47  ;;  %v171_v50 = vadd.f32 %v217_v26, %v170_v48  ;;  %v249_v51 = vpop.f32.mrb[6].mxu0  ;;  %v257_v52 = vpop.f32.mrb[6].mxu1 }
  0xe8   :  { %191 = vst [vmem:[#allocation2 + $0x30] sm:$0xff] %v147_v45  ;;  %199 = vst [vmem:[#allocation2 + $0x70] sm:$0xff] %v179_v46  ;;  %v150_v53 = vadd.f32 %v249_v51, %v217_v26  ;;  %v182_v54 = vadd.f32 %v257_v52, %v217_v26  ;;  %v141_v55 = vpop.f32.mrb[7].mxu0  ;;  %v173_v56 = vpop.f32.mrb[7].mxu1 }
  0xe9   :  { %189 = vst [vmem:[#allocation2 + $0x20] sm:$0xff] %v139_v49  ;;  %197 = vst [vmem:[#allocation2 + $0x60] sm:$0xff] %v171_v50  ;;  %v142_v57 = vadd.f32 %v217_v26, %v141_v55  ;;  %v174_v58 = vadd.f32 %v217_v26, %v173_v56 }
  0xea   :  { %192 = vst [vmem:[#allocation2 + $0x38] sm:$0xff] %v150_v53  ;;  %200 = vst [vmem:[#allocation2 + $0x78] sm:$0xff] %v182_v54 }
  0xeb   :  { %190 = vst [vmem:[#allocation2 + $0x28] sm:$0xff] %v142_v57  ;;  %198 = vst [vmem:[#allocation2 + $0x68] sm:$0xff] %v174_v58 }
  0xec   :  { %278 = shalt.err (!%p275_p4)
}
  0xed   :  { %s279_s24 = scalar_lea.hbm %s394_s3, 2048 }
  0xee   :  { %p280_p5 = scmp.ne.s32.totalorder %s394_s3, %s279_s24  ;;  %p283_p6 = scmp.lt.u32.totalorder %s279_s24, %s394_s3 }
  0xf0   :  { %p285_p7 = pnand %p283_p6, %p280_p5 }
  0xf2   :  { %288 = shalt.err (!%p285_p7)
}
  0xf3   :  { %s292_s29 = smov 128   ;;  %s293_s30 = smov 8  }
  0xf4   :  { %212 = dma.vmem_to_hbm [thread:$0]  %s207_s2, 2048, %s394_s3, [#allocation3], %s292_s29, %s292_s29, %s293_s30  }
  0xf5   :  { %289 = dma.done.wait [#allocation3], 2048  }
  0xf6   :  { %290 = vsyncadd [#allocation3], 4294965248 }
  0xf7   :  { %216 = vsyncpa [#allocation3], 1 }

</bundles_post_ra>
